<compile_context>
chip_gen: v7x
topology: tpu7x:2x2x1
jax: 0.10.0
libtpu: 0.0.40
codegen_flags: <defaults>
</compile_context>

<pallas_src>
import jax
import jax.numpy as jnp
from jax.experimental import pallas as pl
from jax.experimental.pallas import tpu as pltpu


def _round_up(n, m):
    return ((n + m - 1) // m) * m


def _mlp_kernel(x_ref, w1_ref, b1_ref, w2_ref, b2_ref, w3_ref, b3_ref, o_ref, xp_ref):
    # In-kernel feature pad (true 29 -> padded 32): zero the scratch, then copy the real
    # features.  Zeroing is cheap VMEM traffic and guarantees the padded K lanes are
    # exactly 0 before the MXU matmul (w1's padded rows are also zeros -> exact result).
    xp_ref[...] = jnp.zeros_like(xp_ref)
    xp_ref[:, : x_ref.shape[1]] = x_ref[...]

    # layer_1 + ReLU   (tile_b, 32) @ (32, 256)
    h1 = jnp.dot(xp_ref[...], w1_ref[...], preferred_element_type=jnp.float32)
    h1 = jnp.maximum(h1 + b1_ref[...], 0.0)
    # layer_2 + ReLU   (tile_b, 256) @ (256, 128)
    h2 = jnp.dot(h1, w2_ref[...], preferred_element_type=jnp.float32)
    h2 = jnp.maximum(h2 + b2_ref[...], 0.0)
    # layer_out (no activation)   (tile_b, 128) @ (128, 8); only column 0 is real,
    # columns 1..7 are exactly zero.  Narrow (8-lane) store -> 16x fewer HBM write bytes.
    out = jnp.dot(h2, w3_ref[...], preferred_element_type=jnp.float32)
    o_ref[...] = (out + b3_ref[...]).astype(o_ref.dtype)


def init_params(key, input_size=29, hidden1=200, hidden2=50):
    """Deterministic synthetic init mirroring nn.Linear shapes (stored transposed)."""
    k1, k2, k3, k4, k5, k6 = jax.random.split(key, 6)
    s1 = 1.0 / jnp.sqrt(input_size)
    s2 = 1.0 / jnp.sqrt(hidden1)
    s3 = 1.0 / jnp.sqrt(hidden2)
    return {
        "w1": jax.random.uniform(k1, (input_size, hidden1), jnp.float32, -s1, s1),
        "b1": jax.random.uniform(k2, (1, hidden1), jnp.float32, -s1, s1),
        "w2": jax.random.uniform(k3, (hidden1, hidden2), jnp.float32, -s2, s2),
        "b2": jax.random.uniform(k4, (1, hidden2), jnp.float32, -s2, s2),
        "w3": jax.random.uniform(k5, (hidden2, 1), jnp.float32, -s3, s3),
        "b3": jax.random.uniform(k6, (1, 1), jnp.float32, -s3, s3),
    }


def pad_params(params):
    """Zero-pad parameters once (at init time) to TPU-friendly shapes.

    29 -> 32, 200 -> 256, 50 -> 128, out 1 -> 8.  Zeros are exact: padded hidden lanes
    stay 0 through ReLU, padded weight rows contribute nothing, padded output columns
    are exactly 0 and get sliced off.
    """
    in_f, h1 = params["w1"].shape
    h2 = params["w2"].shape[1]
    in_pad = _round_up(in_f, 8)       # layer-1 K (x is padded to this inside the kernel)
    h1_pad = _round_up(h1, 128)       # 256
    h2_pad = _round_up(h2, 128)       # 128
    out_pad = 8                       # narrow output slab (full-last-dim block)

    def pad2(a, rows, cols):
        return jnp.pad(a, ((0, rows - a.shape[0]), (0, cols - a.shape[1])))

    return {
        "w1": pad2(params["w1"], in_pad, h1_pad),
        "b1": pad2(params["b1"], 1, h1_pad),
        "w2": pad2(params["w2"], h1_pad, h2_pad),
        "b2": pad2(params["b2"], 1, h2_pad),
        "w3": pad2(params["w3"], h2_pad, out_pad),
        "b3": pad2(params["b3"], 1, out_pad),
        "true_in": in_f,
    }


def pe_model_forward(x, pparams, *, tile_b=2048):
    """x: (B, input_size) float32 (unpadded); pparams: output of pad_params().

    tile_b: batch tile (default 2048; sweep 2048-4096 for large batches).  Tiny batches
    automatically shrink the tile so there is no wasted compute at B=8.
    """
    B, in_f = x.shape
    assert in_f == pparams["true_in"], (in_f, pparams["true_in"])
    in_pad, h1_pad = pparams["w1"].shape
    h2_pad = pparams["w2"].shape[1]
    out_pad = pparams["b3"].shape[1]

    # Batch tile: multiple of 8 sublanes, never (much) larger than the batch.  B not
    # divisible by tile_b is fine: the final partial block's OOB rows are dropped.
    tile_b = max(8, min(tile_b, _round_up(B, 8)))
    tile_b = _round_up(tile_b, 8)
    grid = (pl.cdiv(B, tile_b),)

    out = pl.pallas_call(
        _mlp_kernel,
        out_shape=jax.ShapeDtypeStruct((B, out_pad), jnp.float32),
        grid=grid,
        in_specs=[
            # streamed batch tiles of x at its true feature width (no wrapper pad pass)
            pl.BlockSpec((tile_b, in_f), lambda i: (i, 0)),
            # weights/biases: constant index_map -> fetched once, resident in VMEM
            pl.BlockSpec((in_pad, h1_pad), lambda i: (0, 0)),
            pl.BlockSpec((1, h1_pad), lambda i: (0, 0)),
            pl.BlockSpec((h1_pad, h2_pad), lambda i: (0, 0)),
            pl.BlockSpec((1, h2_pad), lambda i: (0, 0)),
            pl.BlockSpec((h2_pad, out_pad), lambda i: (0, 0)),
            pl.BlockSpec((1, out_pad), lambda i: (0, 0)),
        ],
        out_specs=pl.BlockSpec((tile_b, out_pad), lambda i: (i, 0)),
        scratch_shapes=[pltpu.VMEM((tile_b, in_pad), jnp.float32)],  # in-kernel K pad
        compiler_params=pltpu.CompilerParams(
            # batch tiles are independent -> megacore sharding on v7x (no-op on v5e/v6e)
            dimension_semantics=("parallel",),
            # room for tile_b sweeps up to ~4096 on v5e (16 MiB scoped default) and v7x
            # (64 MiB physical); ~10-12 MiB actually used at the default tile_b=2048.
            vmem_limit_bytes=32 * 1024 * 1024,
        ),
    )(x, pparams["w1"], pparams["b1"], pparams["w2"],
      pparams["b2"], pparams["w3"], pparams["b3"])

    # Drop the 7 padded (exactly-zero) output lanes; rows are already exactly B.
    return out[:, :1]


def _reference_forward(x, p):
    h1 = jnp.maximum(x @ p["w1"] + p["b1"], 0.0)
    h2 = jnp.maximum(h1 @ p["w2"] + p["b2"], 0.0)
    return h2 @ p["w3"] + p["b3"]


if __name__ == "__main__":
    key = jax.random.PRNGKey(0)
    kx, kp = jax.random.split(key)

    batch, input_size = 8, 29  # is_full=True configuration: 29 -> 200 -> 50 -> 1
    x = jax.random.normal(kx, (batch, input_size), jnp.float32)
    params = init_params(kp, input_size=input_size, hidden1=200, hidden2=50)
    pparams = pad_params(params)

    out = pe_model_forward(x, pparams)
    out = jax.block_until_ready(out)

    ref = _reference_forward(x, params)
    assert out.shape == (batch, 1), out.shape
    assert jnp.allclose(out, ref, atol=1e-4, rtol=1e-4), "mismatch vs JAX reference"

    print("KERNEL_OK")
</pallas_src>

<mosaic_0001>
module attributes {stable_mosaic.version = 11 : i64} {
  func.func @_mlp_kernel(%arg0: i32, %arg1: memref<8x29xf32, #tpu.memory_space<vmem>>, %arg2: memref<32x256xf32, #tpu.memory_space<vmem>>, %arg3: memref<1x256xf32, #tpu.memory_space<vmem>>, %arg4: memref<256x128xf32, #tpu.memory_space<vmem>>, %arg5: memref<1x128xf32, #tpu.memory_space<vmem>>, %arg6: memref<128x8xf32, #tpu.memory_space<vmem>>, %arg7: memref<1x8xf32, #tpu.memory_space<vmem>>, %arg8: memref<8x8xf32, #tpu.memory_space<vmem>>, %arg9: memref<8x32xf32, #tpu.memory_space<vmem>>) attributes {dimension_semantics = [#tpu.dimension_semantics<parallel>], iteration_bounds = array<i64: 1>, scalar_prefetch = 0 : i64, scratch_operands = 1 : i64, tpu.core_type = #tpu.core_type<tc>, window_params = [{transform_indices = @transform_0, window_bounds = array<i64: 8, 29>}, {pipeline_mode = #tpu.pipeline_mode<synchronous>, transform_indices = @transform_1, window_bounds = array<i64: 32, 256>}, {pipeline_mode = #tpu.pipeline_mode<synchronous>, transform_indices = @transform_2, window_bounds = array<i64: 1, 256>}, {pipeline_mode = #tpu.pipeline_mode<synchronous>, transform_indices = @transform_3, window_bounds = array<i64: 256, 128>}, {pipeline_mode = #tpu.pipeline_mode<synchronous>, transform_indices = @transform_4, window_bounds = array<i64: 1, 128>}, {pipeline_mode = #tpu.pipeline_mode<synchronous>, transform_indices = @transform_5, window_bounds = array<i64: 128, 8>}, {pipeline_mode = #tpu.pipeline_mode<synchronous>, transform_indices = @transform_6, window_bounds = array<i64: 1, 8>}, {transform_indices = @transform_7, window_bounds = array<i64: 8, 8>}]} {
    %cst = arith.constant 0.000000e+00 : f32
    %0 = vector.broadcast %cst : f32 to vector<8x32xf32>
    %c0 = arith.constant 0 : index
    %c0_0 = arith.constant 0 : index
    %1 = vector.load %arg9[%c0, %c0_0] : memref<8x32xf32, #tpu.memory_space<vmem>>, vector<8x32xf32>
    tpu.vector_store %arg9[%c0, %c0_0], %0 {strides = array<i32>} : memref<8x32xf32, #tpu.memory_space<vmem>>, vector<8x32xf32>,
    %c0_1 = arith.constant 0 : index
    %c0_2 = arith.constant 0 : index
    %2 = vector.load %arg1[%c0_1, %c0_2] : memref<8x29xf32, #tpu.memory_space<vmem>>, vector<8x29xf32>
    %c0_3 = arith.constant 0 : index
    %c0_4 = arith.constant 0 : index
    %3 = vector.load %arg9[%c0_3, %c0_4] : memref<8x32xf32, #tpu.memory_space<vmem>>, vector<8x29xf32>
    tpu.vector_store %arg9[%c0_3, %c0_4], %2 {strides = array<i32>} : memref<8x32xf32, #tpu.memory_space<vmem>>, vector<8x29xf32>,
    %c0_5 = arith.constant 0 : index
    %c0_6 = arith.constant 0 : index
    %4 = vector.load %arg9[%c0_5, %c0_6] : memref<8x32xf32, #tpu.memory_space<vmem>>, vector<8x32xf32>
    %c0_7 = arith.constant 0 : index
    %c0_8 = arith.constant 0 : index
    %5 = vector.load %arg2[%c0_7, %c0_8] : memref<32x256xf32, #tpu.memory_space<vmem>>, vector<32x256xf32>
    %cst_9 = arith.constant dense<0.000000e+00> : vector<8x256xf32>
    %6 = tpu.matmul %4, %5, %cst_9 {dimension_numbers = #tpu.dot_dimension_numbers<[1], [0], [0], [1], [0, 0, 1, 1], [], []>} : vector<8x32xf32>, vector<32x256xf32>, vector<8x256xf32> -> vector<8x256xf32>
    %c0_10 = arith.constant 0 : index
    %c0_11 = arith.constant 0 : index
    %7 = vector.load %arg3[%c0_10, %c0_11] : memref<1x256xf32, #tpu.memory_space<vmem>>, vector<1x256xf32>
    %8 = vector.broadcast %7 : vector<1x256xf32> to vector<8x256xf32>
    %9 = arith.addf %6, %8 : vector<8x256xf32>
    %cst_12 = arith.constant 0.000000e+00 : f32
    %10 = vector.broadcast %cst_12 : f32 to vector<8x256xf32>
    %11 = arith.maximumf %9, %10 : vector<8x256xf32>
    %c0_13 = arith.constant 0 : index
    %c0_14 = arith.constant 0 : index
    %12 = vector.load %arg4[%c0_13, %c0_14] : memref<256x128xf32, #tpu.memory_space<vmem>>, vector<256x128xf32>
    %cst_15 = arith.constant dense<0.000000e+00> : vector<8x128xf32>
    %13 = tpu.matmul %11, %12, %cst_15 {dimension_numbers = #tpu.dot_dimension_numbers<[1], [0], [0], [1], [0, 0, 1, 1], [], []>} : vector<8x256xf32>, vector<256x128xf32>, vector<8x128xf32> -> vector<8x128xf32>
    %c0_16 = arith.constant 0 : index
    %c0_17 = arith.constant 0 : index
    %14 = vector.load %arg5[%c0_16, %c0_17] : memref<1x128xf32, #tpu.memory_space<vmem>>, vector<1x128xf32>
    %15 = vector.broadcast %14 : vector<1x128xf32> to vector<8x128xf32>
    %16 = arith.addf %13, %15 : vector<8x128xf32>
    %cst_18 = arith.constant 0.000000e+00 : f32
    %17 = vector.broadcast %cst_18 : f32 to vector<8x128xf32>
    %18 = arith.maximumf %16, %17 : vector<8x128xf32>
    %c0_19 = arith.constant 0 : index
    %c0_20 = arith.constant 0 : index
    %19 = vector.load %arg6[%c0_19, %c0_20] : memref<128x8xf32, #tpu.memory_space<vmem>>, vector<128x8xf32>
    %cst_21 = arith.constant dense<0.000000e+00> : vector<8x8xf32>
    %20 = tpu.matmul %18, %19, %cst_21 {dimension_numbers = #tpu.dot_dimension_numbers<[1], [0], [0], [1], [0, 0, 1, 1], [], []>} : vector<8x128xf32>, vector<128x8xf32>, vector<8x8xf32> -> vector<8x8xf32>
    %c0_22 = arith.constant 0 : index
    %c0_23 = arith.constant 0 : index
    %21 = vector.load %arg7[%c0_22, %c0_23] : memref<1x8xf32, #tpu.memory_space<vmem>>, vector<1x8xf32>
    %22 = vector.broadcast %21 : vector<1x8xf32> to vector<8x8xf32>
    %23 = arith.addf %20, %22 : vector<8x8xf32>
    %c0_24 = arith.constant 0 : index
    %c0_25 = arith.constant 0 : index
    %24 = vector.load %arg8[%c0_24, %c0_25] : memref<8x8xf32, #tpu.memory_space<vmem>>, vector<8x8xf32>
    tpu.vector_store %arg8[%c0_24, %c0_25], %23 {strides = array<i32>} : memref<8x8xf32, #tpu.memory_space<vmem>>, vector<8x8xf32>,
    return
  }
  func.func @transform_0(%arg0: i32) -> (i32, i32) {
    %c0_i32 = arith.constant 0 : i32
    %c0_i32_0 = arith.constant 0 : i32
    return %arg0, %c0_i32 : i32, i32
  }
  func.func @transform_1(%arg0: i32) -> (i32, i32) {
    %c0_i32 = arith.constant 0 : i32
    %c0_i32_0 = arith.constant 0 : i32
    %c0_i32_1 = arith.constant 0 : i32
    return %c0_i32, %c0_i32_0 : i32, i32
  }
  func.func @transform_2(%arg0: i32) -> (i32, i32) {
    %c0_i32 = arith.constant 0 : i32
    %c0_i32_0 = arith.constant 0 : i32
    %c0_i32_1 = arith.constant 0 : i32
    return %c0_i32, %c0_i32_0 : i32, i32
  }
  func.func @transform_3(%arg0: i32) -> (i32, i32) {
    %c0_i32 = arith.constant 0 : i32
    %c0_i32_0 = arith.constant 0 : i32
    %c0_i32_1 = arith.constant 0 : i32
    return %c0_i32, %c0_i32_0 : i32, i32
  }
  func.func @transform_4(%arg0: i32) -> (i32, i32) {
    %c0_i32 = arith.constant 0 : i32
    %c0_i32_0 = arith.constant 0 : i32
    %c0_i32_1 = arith.constant 0 : i32
    return %c0_i32, %c0_i32_0 : i32, i32
  }
  func.func @transform_5(%arg0: i32) -> (i32, i32) {
    %c0_i32 = arith.constant 0 : i32
    %c0_i32_0 = arith.constant 0 : i32
    %c0_i32_1 = arith.constant 0 : i32
    return %c0_i32, %c0_i32_0 : i32, i32
  }
  func.func @transform_6(%arg0: i32) -> (i32, i32) {
    %c0_i32 = arith.constant 0 : i32
    %c0_i32_0 = arith.constant 0 : i32
    %c0_i32_1 = arith.constant 0 : i32
    return %c0_i32, %c0_i32_0 : i32, i32
  }
  func.func @transform_7(%arg0: i32) -> (i32, i32) {
    %c0_i32 = arith.constant 0 : i32
    %c0_i32_0 = arith.constant 0 : i32
    return %arg0, %c0_i32 : i32, i32
  }
}

</mosaic_0001>

<bundles_post_ra>
// kernel: tpu_custom_call.1
= control target key start
LH: loop header
LB: loop body
LE: loop exit
PB: predicated region body
PF: predicated region fallthrough
CT: control target
= control target key end

     0   :  { %12 = vsyncpa [#allocation4], 0  ;;  %s732_s0 = inlined_call_operand.vmem [shape: f32[8,29], index: 0, kind: input, shape index: {}]   ;;  %s733_s1 = inlined_call_operand.vmem [shape: f32[32,256], index: 1, kind: input, shape index: {}]   ;;  %s734_s2 = inlined_call_operand.vmem [shape: f32[1,256], index: 2, kind: input, shape index: {}]   ;;  %s735_s3 = inlined_call_operand.hbm [shape: f32[256,128], index: 3, kind: input, shape index: {}]   ;;  %s736_s4 = inlined_call_operand.vmem [shape: f32[1,128], index: 4, kind: input, shape index: {}]   ;;  %s737_s5 = inlined_call_operand.vmem [shape: f32[128,8], index: 5, kind: input, shape index: {}]   ;;  %s738_s6 = inlined_call_operand.vmem [shape: f32[1,8], index: 6, kind: input, shape index: {}]   ;;  %s739_s7 = inlined_call_operand.hbm [shape: f32[8,8], index: 7, kind: output, shape index: {}]  }
   0x1   :  { %13 = vsyncpa [#allocation5], 0  ;;  %s572_s24 = smov [#allocation3]   ;;  %s524_s28 = scalar_lea.hbm %s735_s3, 4096 }
   0x2   :  { %s25_s25 = sshll.u32 %s572_s24, 4  ;;  %p525_p0 = scmp.ne.s32.totalorder %s735_s3, %s524_s28  ;;  %s26_s25 = int_to_ptr.vmem [resolvable:$true] %s25_s25 }
   0x3   :  { %p528_p1 = scmp.lt.u32.totalorder %s524_s28, %s735_s3 }
   0x5   :  { %p530_p2 = pnand %p528_p1, %p525_p0 }
   0x7   :  { %533 = shalt.err (!%p530_p2)
}
   0x8   :  { %s534_s10 = scalar_lea.vmem %s26_s25, 4096  ;;  %p539_p4 = scmp.lt.s32.totalorder %s26_s25, %s26_s25 }
   0x9   :  { %p535_p3 = scmp.ne.s32.totalorder %s26_s25, %s534_s10  ;;  %p540_p5 = scmp.lt.s32.totalorder %s534_s10, %s534_s10 }
   0xb   :  { %p541_p6 = por %p540_p5, %p539_p4 }
   0xd   :  { %p542_p7 = pnand %p541_p6, %p535_p3 }
   0xf   :  { %545 = shalt.err (!%p542_p7)
}
  0x10   :  { %s573_s11 = smov 128   ;;  %s574_s12 = smov 8  }
  0x11   :  { %31 = dma.hbm_to_vmem [thread:$0]  %s735_s3, 4096, %s26_s25, [#allocation4], %s573_s11, %s573_s11, %s574_s12  }
  0x12   :  { %568 = dma.done.wait [#allocation4], 4096  }
  0x13   :  { %569 = vsyncadd [#allocation4], 4294963200  ;;  %vm41_vm0 = vcmask 261120   ;;  %v575_v0 = vmov 0.0   ;;  %v48_v1 = vld [vmem:[%s733_s1 + $0x8] sm:$0xff]  ;;  %v50_v2 = vld [vmem:[%s733_s1 + $0x18] sm:$0xff] }
  0x14   :  { %134 = vmatprep.mubr.f32.mxu0 %v575_v0  ;;  %42 = vst.msk [vmem:[#allocation2] sm:$0xff] %vm41_vm0, %v575_v0  ;;  %v47_v3 = vld [vmem:[%s733_s1] sm:$0xff]  ;;  %vm44_vm1 = vcmask 236544   ;;  %v453_v4 = vpack.c.bf16 %v50_v2, %v48_v1  ;;  %v49_v5 = vld [vmem:[%s733_s1 + $0x10] sm:$0xff]  ;;  %v52_v6 = vld [vmem:[%s733_s1 + $0x28] sm:$0xff]  ;;  %vm577_vm2 = vmmov 0  }
  0x15   :  { %v54_v7 = vld [vmem:[%s733_s1 + $0x38] sm:$0xff]  ;;  %v455_v8 = vpack.c.bf16 %v49_v5, %v47_v3  ;;  %v51_v10 = vld [vmem:[%s733_s1 + $0x20] sm:$0xff]  ;;  %v53_v11 = vld [vmem:[%s733_s1 + $0x30] sm:$0xff]  ;;  %v576_v3 = vmov 0.0|0.0   ;;  %vm346_vm3 = vcmask 64512  }
  0x16   :  { %v457_v9 = vpack.c.bf16 %v54_v7, %v52_v6  ;;  %v43_v12 = vld [vmem:[%s732_s0] sm:$0xff]  ;;  %454 = vmatprep.subr.bf16.mxu0 %v453_v4  ;;  %v159_v13 = vld [vmem:[#allocation3 + $0x80] sm:$0xff]  ;;  %v160_v14 = vld [vmem:[#allocation3 + $0x88] sm:$0xff]  ;;  %v459_v16 = vpack.c.bf16 %v53_v11, %v51_v10 }
  0x17   :  { %45 = vst.msk [vmem:[#allocation2] sm:$0xff] %vm44_vm1, %v43_v12  ;;  %v143_v15 = vld [vmem:[#allocation3] sm:$0xff]  ;;  %456 = vmatpush1.bf16.msra.mxu0 %v455_v8  ;;  %v461_v17 = vpack.c.bf16 %v160_v14, %v159_v13  ;;  %v144_v18 = vld [vmem:[#allocation3 + $0x8] sm:$0xff]  ;;  %v161_v19 = vld [vmem:[#allocation3 + $0x90] sm:$0xff] }
  0x18   :  { %v162_v20 = vld [vmem:[#allocation3 + $0x98] sm:$0xff]  ;;  %458 = vmatprep.subr.bf16.mxu0 %v457_v9  ;;  %v463_v21 = vpack.c.bf16 %v144_v18, %v143_v15  ;;  %v145_v23 = vld [vmem:[#allocation3 + $0x10] sm:$0xff]  ;;  %v163_v25 = vld [vmem:[#allocation3 + $0xa0] sm:$0xff] }
  0x19   :  { %v465_v22 = vpack.c.bf16 %v162_v20, %v161_v19  ;;  %v146_v24 = vld [vmem:[#allocation3 + $0x18] sm:$0xff]  ;;  %462 = vmatprep.subr.bf16.mxu1 %v461_v17  ;;  %v164_v26 = vld [vmem:[#allocation3 + $0xa8] sm:$0xff]  ;;  %v147_v29 = vld [vmem:[#allocation3 + $0x20] sm:$0xff]  ;;  %v57_v19 = vlaneseq }
  0x1a   :  { %464 = vmatpush3.bf16.msra.mxu1 %v463_v21  ;;  %v467_v27 = vpack.c.bf16 %v146_v24, %v145_v23  ;;  %v469_v28 = vpack.c.bf16 %v164_v26, %v163_v25  ;;  %v148_v30 = vld [vmem:[#allocation3 + $0x28] sm:$0xff]  ;;  %v165_v31 = vld [vmem:[#allocation3 + $0xb0] sm:$0xff]  ;;  %v166_v32 = vld [vmem:[#allocation3 + $0xb8] sm:$0xff] }
  0x1b   :  { %460 = vmatpush1.bf16.msra.mxu0 %v459_v16  ;;  %466 = vmatprep.subr.bf16.mxu1 %v465_v22  ;;  %v471_v34 = vpack.c.bf16 %v148_v30, %v147_v29  ;;  %v473_v35 = vpack.c.bf16 %v166_v32, %v165_v31  ;;  %v149_v36 = vld [vmem:[#allocation3 + $0x30] sm:$0xff]  ;;  %v150_v37 = vld [vmem:[#allocation3 + $0x38] sm:$0xff]  ;;  %v167_v38 = vld [vmem:[#allocation3 + $0xc0] sm:$0xff]  ;;  %v58_v20 = vshrl.u32 %v57_v19, 7 }
  0x1c   :  { %v168_v39 = vld [vmem:[#allocation3 + $0xc8] sm:$0xff]  ;;  %v475_v40 = vpack.c.bf16 %v150_v37, %v149_v36  ;;  %v151_v42 = vld [vmem:[#allocation3 + $0x40] sm:$0xff]  ;;  %v169_v44 = vld [vmem:[#allocation3 + $0xd0] sm:$0xff]  ;;  %493 = vmatprep.subr.bf16.mxu0 %v576_v3 }
  0x1d   :  { %v477_v41 = vpack.c.bf16 %v168_v39, %v167_v38  ;;  %v152_v43 = vld [vmem:[#allocation3 + $0x48] sm:$0xff]  ;;  %v170_v45 = vld [vmem:[#allocation3 + $0xd8] sm:$0xff]  ;;  %v153_v48 = vld [vmem:[#allocation3 + $0x50] sm:$0xff]  ;;  %v59_v21 = vsub.s32 0, %v58_v20  ;;  %v63_v23 = vsub.s32 1, %v58_v20 }
  0x1e   :  { %v46_v33 = vld [vmem:[#allocation2] sm:$0xff]  ;;  %468 = vmatpush3.bf16.msra.mxu1 %v467_v27  ;;  %v479_v46 = vpack.c.bf16 %v152_v43, %v151_v42  ;;  %v481_v47 = vpack.c.bf16 %v170_v45, %v169_v44  ;;  %v171_v50 = vld [vmem:[#allocation3 + $0xe0] sm:$0xff]  ;;  %v172_v51 = vld [vmem:[#allocation3 + $0xe8] sm:$0xff] }
  0x1f   :  { %363 = vmatmul.mubr.msk.f32.vlgmr.msra.gmra.mrb[0].mxu0 %vm41_vm0, %v46_v33  ;;  %470 = vmatprep.subr.bf16.mxu1 %v469_v28  ;;  %v154_v49 = vld [vmem:[#allocation3 + $0x58] sm:$0xff]  ;;  %v485_v53 = vpack.c.bf16 %v172_v51, %v171_v50  ;;  %v155_v54 = vld [vmem:[#allocation3 + $0x60] sm:$0xff]  ;;  %v156_v55 = vld [vmem:[#allocation3 + $0x68] sm:$0xff] }
  0x20   :  { %v483_v52 = vpack.c.bf16 %v154_v49, %v153_v48  ;;  %v487_v56 = vpack.c.bf16 %v156_v55, %v155_v54  ;;  %v173_v57 = vld [vmem:[#allocation3 + $0xf0] sm:$0xff]  ;;  %v174_v58 = vld [vmem:[#allocation3 + $0xf8] sm:$0xff]  ;;  %v254_v1 = vld [vmem:[%s737_s5 + $0x8] sm:$0xff]  ;;  %450 = vmatprep.mubr.msk.f32.mxu0 %vm577_vm2, %v575_v0 }
  0x21   :  { %v489_v59 = vpack.c.bf16 %v174_v58, %v173_v57  ;;  %v157_v60 = vld [vmem:[#allocation3 + $0x70] sm:$0xff]  ;;  %v158_v61 = vld [vmem:[#allocation3 + $0x78] sm:$0xff]  ;;  %v255_v2 = vld [vmem:[%s737_s5 + $0x10] sm:$0xff] }
  0x22   :  { %472 = vmatpush3.bf16.msra.mxu1 %v471_v34  ;;  %v491_v62 = vpack.c.bf16 %v158_v61, %v157_v60  ;;  %v253_v63 = vld [vmem:[%s737_s5] sm:$0xff]  ;;  %v256_v5 = vld [vmem:[%s737_s5 + $0x18] sm:$0xff]  ;;  %v258_v8 = vld [vmem:[%s737_s5 + $0x28] sm:$0xff] }
  0x23   :  { %474 = vmatprep.subr.bf16.mxu1 %v473_v35  ;;  %v494_v4 = vpack.c.bf16 %v254_v1, %v253_v63  ;;  %v497_v6 = vpack.c.bf16 %v256_v5, %v255_v2  ;;  %v257_v7 = vld [vmem:[%s737_s5 + $0x20] sm:$0xff]  ;;  %v259_v10 = vld [vmem:[%s737_s5 + $0x30] sm:$0xff]  ;;  %v260_v11 = vld [vmem:[%s737_s5 + $0x38] sm:$0xff] }
  0x24   :  { %v500_v9 = vpack.c.bf16 %v258_v8, %v257_v7  ;;  %v503_v12 = vpack.c.bf16 %v260_v11, %v259_v10  ;;  %v261_v13 = vld [vmem:[%s737_s5 + $0x40] sm:$0xff]  ;;  %v262_v14 = vld [vmem:[%s737_s5 + $0x48] sm:$0xff]  ;;  %v263_v16 = vld [vmem:[%s737_s5 + $0x50] sm:$0xff] }
  0x25   :  { %495 = vmatpush3.bf16.msra.mxu0 %v494_v4  ;;  %v506_v15 = vpack.c.bf16 %v262_v14, %v261_v13  ;;  %v264_v17 = vld [vmem:[%s737_s5 + $0x58] sm:$0xff]  ;;  %v55_v22 = vld [vmem:[%s734_s2] sm:$0x3]  ;;  %v266_v33 = vld [vmem:[%s737_s5 + $0x68] sm:$0xff] }
  0x26   :  { %476 = vmatpush3.bf16.msra.mxu1 %v475_v40  ;;  %496 = vmatprep.subr.bf16.mxu0 %v576_v3  ;;  %v509_v18 = vpack.c.bf16 %v264_v17, %v263_v16  ;;  %v60_v24 = vrot.slane %v55_v22, %v59_v21  ;;  %v64_v25 = vrot.slane %v55_v22, %v63_v23  ;;  %v265_v32 = vld [vmem:[%s737_s5 + $0x60] sm:$0xff]  ;;  %v267_v35 = vld [vmem:[%s737_s5 + $0x70] sm:$0xff]  ;;  %v268_v36 = vld [vmem:[%s737_s5 + $0x78] sm:$0xff]  ;;  %s578_s5 = smov [#allocation6]  }
  0x27   :  { %478 = vmatprep.subr.bf16.mxu1 %v477_v41  ;;  %v512_v34 = vpack.c.bf16 %v266_v33, %v265_v32  ;;  %v515_v37 = vpack.c.bf16 %v268_v36, %v267_v35  ;;  %v364_v39 = vld [vmem:[%s736_s4] ss:$0 sm:$0xff]  ;;  %s354_s18 = sshll.u32 %s578_s5, 4  ;;  %s355_s18 = int_to_ptr.vmem [resolvable:$true] %s354_s18 }
  0x28   :  { %v365_v44 = vld [vmem:[%s738_s6] ss:$0 sm:$0xff]  ;;  %s546_s19 = scalar_lea.vmem %s355_s18, 128  ;;  %p551_p9 = scmp.lt.s32.totalorder %s355_s18, %s355_s18 }
  0x29   :  { %498 = vmatpush3.bf16.msra.mxu0 %v497_v6  ;;  %p547_p8 = scmp.ne.s32.totalorder %s355_s18, %s546_s19  ;;  %p552_p10 = scmp.lt.s32.totalorder %s546_s19, %s546_s19 }
  0x2a   :  { %480 = vmatpush3.bf16.msra.mxu1 %v479_v46  ;;  %499 = vmatprep.subr.bf16.mxu0 %v576_v3 }
  0x2b   :  { %482 = vmatprep.subr.bf16.mxu1 %v481_v47  ;;  %p553_p11 = por %p552_p10, %p551_p9 }
  0x2d   :  { %501 = vmatpush3.bf16.msra.mxu0 %v500_v9  ;;  %p554_p12 = pnand %p553_p11, %p547_p8 }
  0x2e   :  { %484 = vmatpush3.bf16.msra.mxu1 %v483_v52  ;;  %502 = vmatprep.subr.bf16.mxu0 %v576_v3 }
  0x2f   :  { %486 = vmatprep.subr.bf16.mxu1 %v485_v53 }
  0x31   :  { %504 = vmatpush3.bf16.msra.mxu0 %v503_v12 }
  0x32   :  { %488 = vmatpush3.bf16.msra.mxu1 %v487_v56  ;;  %505 = vmatprep.subr.bf16.mxu0 %v576_v3 }
  0x33   :  { %490 = vmatprep.subr.bf16.mxu1 %v489_v59 }
  0x35   :  { %507 = vmatpush3.bf16.msra.mxu0 %v506_v15 }
  0x36   :  { %492 = vmatpush3.bf16.msra.mxu1 %v491_v62  ;;  %508 = vmatprep.subr.bf16.mxu0 %v576_v3 }
  0x39   :  { %510 = vmatpush3.bf16.msra.mxu0 %v509_v18 }
  0x3a   :  { %511 = vmatprep.subr.bf16.mxu0 %v576_v3 }
  0x3d   :  { %513 = vmatpush3.bf16.msra.mxu0 %v512_v34 }
  0x3e   :  { %514 = vmatprep.subr.bf16.mxu0 %v576_v3 }
  0x41   :  { %516 = vmatpush3.bf16.msra.mxu0 %v515_v37 }
  0xf2   :  { %v136_v26 = vpop.f32.mrb[0].mxu0 }
  0xf3   :  { %v137_v27 = vadd.f32 %v136_v26, %v60_v24  ;;  %v138_v28 = vpop.f32.mrb[1].mxu0 }
  0xf4   :  { %v139_v29 = vadd.f32 %v138_v28, %v64_v25 }
  0xf5   :  { %v141_v31 = vmax.f32 %v137_v27, 0.0 }
  0xf6   :  { %v142_v30 = vmax.f32 %v139_v29, 0.0 }
  0xf8   :  { %246 = vmatprep.mubr.f32.mxu1 %v142_v30 }
  0xf9   :  { %247 = vmatmul.mubr.f32.vlgmr.msra.gmra.mrb[0].mxu1 %v141_v31 }
 0x1cc   :  { %v398_v38 = vpop.f32.mrb[0].mxu1 }
 0x1cd   :  { %v399_v40 = vpop.f32.mrb[1].mxu1 }
 0x1ce   :  { %v400_v41 = vadd.f32 %v399_v40, %v398_v38 }
 0x1d0   :  { %v249_v42 = vadd.f32 %v400_v41, %v364_v39 }
 0x1d2   :  { %v252_v43 = vmax.f32 %v249_v42, 0.0 }
 0x1d4   :  { %451 = vmatmul.mubr.f32.vlgmr.msra.gmra.mrb[2].mxu0 %v252_v43 }
 0x2a7   :  { %v342_v45 = vpop.f32.mrb[2].mxu0 }
 0x2a8   :  { %v343_v46 = vadd.f32 %v365_v44, %v342_v45  ;;  %v452_v0 = vpop.f32.mrb[3].mxu0 }
 0x2aa   :  { %347 = vst.msk [vmem:[#allocation6] sm:$0xff] %vm346_vm3, %v343_v46 }
 0x2ab   :  { %557 = shalt.err (!%p554_p12)
}
 0x2ac   :  { %s558_s3 = scalar_lea.hbm %s739_s7, 128 }
 0x2ad   :  { %p559_p13 = scmp.ne.s32.totalorder %s739_s7, %s558_s3  ;;  %p562_p0 = scmp.lt.u32.totalorder %s558_s3, %s739_s7 }
 0x2af   :  { %p564_p1 = pnand %p562_p0, %p559_p13 }
 0x2b1   :  { %567 = shalt.err (!%p564_p1)
}
 0x2b2   :  { %357 = dma.vmem_to_hbm [thread:$0]  %s355_s18, 128, %s739_s7, [#allocation5]  }
 0x2b3   :  { %570 = dma.done.wait [#allocation5], 128  }
 0x2b4   :  { %571 = vsyncadd [#allocation5], 4294967168 }
 0x2b5   :  { %361 = vsyncpa [#allocation4], 1 }
 0x2b6   :  { %362 = vsyncpa [#allocation5], 1 }

</bundles_post_ra>
